<compile_context>
chip_gen: v6e
topology: v6e:2x2x1
jax: 0.10.0
libtpu: 0.0.40
codegen_flags: <defaults>
</compile_context>

<pallas_src>
import math

import jax
import jax.numpy as jnp
from jax.experimental import pallas as pl
from jax.experimental.pallas import tpu as pltpu


def _round_up(x: int, m: int) -> int:
    return ((x + m - 1) // m) * m


def box_muller_kernel(u1_ref, u2_ref, o_ref):
    """Turn two uniform tiles into one tile of i.i.d. N(0,1) samples.

    u1_ref, u2_ref: (half, D) uniforms in [0, 1)
    o_ref:          (2*half, D) standard normals
    Both Box-Muller branches are used, so each uniform pair produces two
    outputs (half the transcendental work per element vs. cos-only).
    """
    half = u1_ref.shape[0]
    u1 = 1.0 - u1_ref[...]            # [0,1) -> (0,1], safe for log
    u2 = u2_ref[...]
    r = jnp.sqrt(-2.0 * jnp.log(u1))
    theta = u2 * jnp.float32(2.0 * math.pi)
    z0 = r * jnp.cos(theta)
    z1 = r * jnp.sin(theta)
    o_ref[0:half, :] = z0.astype(o_ref.dtype)
    o_ref[half:2 * half, :] = z1.astype(o_ref.dtype)


def example_text_encoder_forward(vocabulary, output_dims, key, *, max_block_rows=512):
    """Pallas equivalent of ExampleTextEncoder.forward()."""
    num_classes = len(vocabulary)

    # Lane-dense last dim (multiple of 128); rows padded to a multiple of 16 so
    # each block splits into two (>=8)-sublane halves for the Box-Muller pair.
    d_pad = _round_up(output_dims, 128)
    rows16 = _round_up(num_classes, 16)
    block_rows = min(_round_up(max_block_rows, 16), rows16)
    rows_pad = _round_up(rows16, block_rows)
    grid_rows = rows_pad // block_rows
    half_block = block_rows // 2

    # Uniform entropy supplied by jax.random (backend-agnostic); the kernel does
    # the normal transform.  Each pair row produces two output rows.
    k1, k2 = jax.random.split(key)
    u1 = jax.random.uniform(k1, (rows_pad // 2, d_pad), dtype=jnp.float32)
    u2 = jax.random.uniform(k2, (rows_pad // 2, d_pad), dtype=jnp.float32)

    out_padded = pl.pallas_call(
        box_muller_kernel,
        out_shape=jax.ShapeDtypeStruct((rows_pad, d_pad), jnp.float32),
        grid=(grid_rows,),
        in_specs=[
            pl.BlockSpec((half_block, d_pad), lambda i: (i, 0)),
            pl.BlockSpec((half_block, d_pad), lambda i: (i, 0)),
        ],
        out_specs=pl.BlockSpec((block_rows, d_pad), lambda i: (i, 0)),
        compiler_params=pltpu.CompilerParams(
            dimension_semantics=("parallel",),
        ),
    )(u1, u2)

    # Slice padding away in the wrapper (keeps in-kernel stores lane-dense).
    return out_padded[:num_classes, :output_dims]


if __name__ == "__main__":
    # Module "inputs": a small vocabulary and an output embedding dim.
    vocabulary = ["cat", "dog", "car", "tree", "sky", "road", "person", "grass"]
    output_dims = 128

    key = jax.random.PRNGKey(0)
    out = example_text_encoder_forward(vocabulary, output_dims, key)
    out = jax.block_until_ready(out)

    assert out.shape == (len(vocabulary), output_dims), out.shape
    assert out.dtype == jnp.float32, out.dtype
    assert bool(jnp.all(jnp.isfinite(out)))
    # Loose sanity check that samples look standard-normal.
    mean = float(jnp.mean(out))
    std = float(jnp.std(out))
    assert abs(mean) < 0.25 and 0.7 < std < 1.3, (mean, std)

    print("KERNEL_OK")
</pallas_src>

<mosaic_0001>
module attributes {stable_mosaic.version = 11 : i64} {
  func.func @box_muller_kernel(%arg0: i32, %arg1: memref<8x128xf32, #tpu.memory_space<vmem>>, %arg2: memref<8x128xf32, #tpu.memory_space<vmem>>, %arg3: memref<16x128xf32, #tpu.memory_space<vmem>>) attributes {dimension_semantics = [#tpu.dimension_semantics<parallel>], iteration_bounds = array<i64: 1>, scalar_prefetch = 0 : i64, scratch_operands = 0 : i64, tpu.core_type = #tpu.core_type<tc>, window_params = [{transform_indices = @transform_0, window_bounds = array<i64: 8, 128>}, {transform_indices = @transform_1, window_bounds = array<i64: 8, 128>}, {transform_indices = @transform_2, window_bounds = array<i64: 16, 128>}]} {
    %c0 = arith.constant 0 : index
    %c0_0 = arith.constant 0 : index
    %0 = vector.load %arg1[%c0, %c0_0] : memref<8x128xf32, #tpu.memory_space<vmem>>, vector<8x128xf32>
    %cst = arith.constant 1.000000e+00 : f32
    %1 = vector.broadcast %cst : f32 to vector<8x128xf32>
    %2 = arith.subf %1, %0 : vector<8x128xf32>
    %c0_1 = arith.constant 0 : index
    %c0_2 = arith.constant 0 : index
    %3 = vector.load %arg2[%c0_1, %c0_2] : memref<8x128xf32, #tpu.memory_space<vmem>>, vector<8x128xf32>
    %4 = math.log %2 : vector<8x128xf32>
    %cst_3 = arith.constant -2.000000e+00 : f32
    %5 = vector.broadcast %cst_3 : f32 to vector<8x128xf32>
    %6 = arith.mulf %5, %4 : vector<8x128xf32>
    %7 = math.sqrt %6 : vector<8x128xf32>
    %cst_4 = arith.constant 6.28318548 : f32
    %8 = vector.broadcast %cst_4 : f32 to vector<8x128xf32>
    %9 = arith.mulf %3, %8 : vector<8x128xf32>
    %10 = math.cos %9 : vector<8x128xf32>
    %11 = arith.mulf %7, %10 : vector<8x128xf32>
    %12 = math.sin %9 : vector<8x128xf32>
    %13 = arith.mulf %7, %12 : vector<8x128xf32>
    %c0_5 = arith.constant 0 : index
    %c0_6 = arith.constant 0 : index
    %14 = vector.load %arg3[%c0_5, %c0_6] : memref<16x128xf32, #tpu.memory_space<vmem>>, vector<8x128xf32>
    tpu.vector_store %arg3[%c0_5, %c0_6], %11 {strides = array<i32>} : memref<16x128xf32, #tpu.memory_space<vmem>>, vector<8x128xf32>,
    %c8 = arith.constant 8 : index
    %c0_7 = arith.constant 0 : index
    %15 = vector.load %arg3[%c8, %c0_7] : memref<16x128xf32, #tpu.memory_space<vmem>>, vector<8x128xf32>
    tpu.vector_store %arg3[%c8, %c0_7], %13 {strides = array<i32>} : memref<16x128xf32, #tpu.memory_space<vmem>>, vector<8x128xf32>,
    return
  }
  func.func @transform_0(%arg0: i32) -> (i32, i32) {
    %c0_i32 = arith.constant 0 : i32
    %c0_i32_0 = arith.constant 0 : i32
    return %arg0, %c0_i32 : i32, i32
  }
  func.func @transform_1(%arg0: i32) -> (i32, i32) {
    %c0_i32 = arith.constant 0 : i32
    %c0_i32_0 = arith.constant 0 : i32
    return %arg0, %c0_i32 : i32, i32
  }
  func.func @transform_2(%arg0: i32) -> (i32, i32) {
    %c0_i32 = arith.constant 0 : i32
    %c0_i32_0 = arith.constant 0 : i32
    return %arg0, %c0_i32 : i32, i32
  }
}

</mosaic_0001>

<bundles_post_ra>
// kernel: tpu_custom_call.1
= control target key start
LH: loop header
LB: loop body
LE: loop exit
PB: predicated region body
PF: predicated region fallthrough
CT: control target
= control target key end

     0   :  { %7 = vsyncpa [#allocation3], 0  ;;  %s432_s0 = inlined_call_operand.hbm [shape: f32[8,128], index: 0, kind: input, shape index: {}]   ;;  %s433_s1 = inlined_call_operand.hbm [shape: f32[8,128], index: 1, kind: input, shape index: {}]   ;;  %s434_s2 = inlined_call_operand.hbm [shape: f32[16,128], index: 2, kind: output, shape index: {}]  }
   0x1   :  { %8 = vsyncpa [#allocation6], 0 }
   0x2   :  { %9 = vsyncpa [#allocation4], 0  ;;  %s376_s9 = smov [#allocation2]   ;;  %s377_s11 = smov [#allocation5]  }
   0x3   :  { %s16_s10 = sshll.u32 %s376_s9, 4  ;;  %s26_s12 = sshll.u32 %s377_s11, 4  ;;  %s17_s10 = int_to_ptr.vmem [resolvable:$true] %s16_s10  ;;  %s27_s12 = int_to_ptr.vmem [resolvable:$true] %s26_s12 }
   0x4   :  { %s318_s13 = scalar_lea.vmem %s17_s10, 128  ;;  %p323_p1 = scmp.lt.s32.totalorder %s17_s10, %s17_s10 }
   0x5   :  { %p319_p0 = scmp.ne.s32.totalorder %s17_s10, %s318_s13  ;;  %p324_p2 = scmp.lt.s32.totalorder %s318_s13, %s318_s13 }
   0x7   :  { %p325_p3 = por %p324_p2, %p323_p1 }
   0x9   :  { %p326_p4 = pnand %p325_p3, %p319_p0 }
   0xb   :  { %329 = shalt.err (!%p326_p4)
}
   0xc   :  { %19 = dma.hbm_to_vmem [thread:$0]  %s432_s0, 128, %s17_s10, [#allocation3]  }
   0xd   :  { %s338_s16 = scalar_lea.vmem %s27_s12, 128  ;;  %p343_p6 = scmp.lt.s32.totalorder %s27_s12, %s27_s12 }
   0xe   :  { %p339_p5 = scmp.ne.s32.totalorder %s27_s12, %s338_s16  ;;  %p344_p7 = scmp.lt.s32.totalorder %s338_s16, %s338_s16 }
  0x10   :  { %p345_p8 = por %p344_p7, %p343_p6 }
  0x12   :  { %p346_p9 = pnand %p345_p8, %p339_p5 }
  0x14   :  { %349 = shalt.err (!%p346_p9)
}
  0x15   :  { %29 = dma.hbm_to_vmem [thread:$0]  %s433_s1, 128, %s27_s12, [#allocation6]  }
  0x16   :  { %370 = dma.done.wait [#allocation3], 128  }
  0x17   :  { %371 = vsyncadd [#allocation3], 4294967168 }
  0x18   :  { %372 = dma.done.wait [#allocation6], 128  }
  0x19   :  { %373 = vsyncadd [#allocation6], 4294967168  ;;  %v38_v0 = vld [vmem:[#allocation5] sm:$0xff]  ;;  %v378_v12 = vmov 683565275   ;;  %v36_v54 = vld [vmem:[#allocation2] sm:$0xff] }
  0x1a   :  { %v408_v1 = vmul.f32 6.2831855, %v38_v0  ;;  %v379_v14 = vmov 2475754826   ;;  %v380_v16 = vmov 2131351028  }
  0x1b   :  { %v381_v18 = vmov 2102212464   ;;  %v382_v20 = vmov 920167782   ;;  %v383_v28 = vmov 1326507024  }
  0x1c   :  { %v53_v2 = vand.u32 2139095040, %v408_v1  ;;  %v50_v5 = vand.u32 2147483647, %v408_v1  ;;  %v37_v57 = vsub.f32 1.0, %v36_v54  ;;  %vm52_vm7 = vcmp.lt.s32.totalorder %v408_v1, 0  ;;  %s384_s0 = smov [#allocation7]  }
  0x1d   :  { %s266_s1 = sshll.u32 %s384_s0, 4  ;;  %s267_s1 = int_to_ptr.vmem [resolvable:$true] %s266_s1 }
  0x1e   :  { %v54_v3 = vshrl.u32 %v53_v2, 23  ;;  %v57_v8 = vand.u32 8388607, %v50_v5  ;;  %302 = vlog2.f32 %v37_v57  ;;  %vm51_vm8 = vcmp.le.f32.partialorder %v50_v5, 0.7853982  ;;  %s350_s19 = scalar_lea.vmem %s267_s1, 256  ;;  %p355_p11 = scmp.lt.s32.totalorder %s267_s1, %s267_s1 }
  0x1f   :  { %p351_p10 = scmp.ne.s32.totalorder %s267_s1, %s350_s19  ;;  %p356_p12 = scmp.lt.s32.totalorder %s350_s19, %s350_s19 }
  0x20   :  { %v279_v4 = vadd.s32 4294967169, %v54_v3  ;;  %v58_v22 = vor.u32 8388608, %v57_v8 }
  0x21   :  { %p357_p13 = por %p356_p12, %p355_p11 }
  0x22   :  { %v60_v6 = vadd.s32 1, %v279_v4  ;;  %v98_v35 = vshll.u32 %v58_v22, 8 }
  0x23   :  { %p358_p0 = pnand %p357_p13, %p351_p10 }
  0x24   :  { %vm61_vm0 = vcmp.gt.s32.totalorder %v60_v6, 0 }
  0x25   :  { %v62_v7 = vsel %vm61_vm0, %v60_v6, 0 }
  0x26   :  { %v64_v9 = vand.u32 31, %v62_v7  ;;  %v63_v10 = vshrl.u32 %v62_v7, 5 }
  0x28   :  { %v65_v11 = vsub.s32 32, %v64_v9  ;;  %v67_v13 = vshll.u32 %v378_v12, %v64_v9  ;;  %v70_v15 = vshll.u32 %v379_v14, %v64_v9  ;;  %v73_v17 = vshll.u32 %v380_v16, %v64_v9 }
  0x29   :  { %v76_v19 = vshll.u32 %v381_v18, %v64_v9  ;;  %v79_v21 = vshll.u32 %v382_v20, %v64_v9  ;;  %vm82_vm1 = vcmp.lt.s32.totalorder %v63_v10, 1  ;;  %vm85_vm2 = vcmp.lt.s32.totalorder %v63_v10, 4 }
  0x2a   :  { %v68_v23 = vshrl.u32 %v379_v14, %v65_v11  ;;  %v71_v24 = vshrl.u32 %v380_v16, %v65_v11  ;;  %v66_v25 = vshrl.u32 %v378_v12, %v65_v11  ;;  %v74_v26 = vshrl.u32 %v381_v18, %v65_v11 }
  0x2b   :  { %v77_v27 = vshrl.u32 %v382_v20, %v65_v11  ;;  %v80_v29 = vshrl.u32 %v383_v28, %v65_v11  ;;  %vm84_vm3 = vcmp.lt.s32.totalorder %v63_v10, 3  ;;  %vm83_vm4 = vcmp.lt.s32.totalorder %v63_v10, 2  ;;  %v303_v4 = vpop.eup %302 }
  0x2c   :  { %v69_v30 = vor.u32 %v68_v23, %v67_v13  ;;  %v72_v31 = vor.u32 %v71_v24, %v70_v15  ;;  %v75_v32 = vor.u32 %v74_v26, %v73_v17  ;;  %v40_v10 = vmul.f32 0.6931472, %v303_v4 }
  0x2d   :  { %v78_v33 = vor.u32 %v77_v27, %v76_v19  ;;  %v81_v34 = vor.u32 %v80_v29, %v79_v21 }
  0x2e   :  { %v86_v36 = vsel %vm82_vm1, %v66_v25, %v69_v30  ;;  %v87_v37 = vsel %vm85_vm2, %v75_v32, 2102212464  ;;  %v90_v38 = vsel %vm82_vm1, %v69_v30, %v72_v31  ;;  %v94_v42 = vsel %vm82_vm1, %v72_v31, %v75_v32 }
  0x2f   :  { %v91_v39 = vsel %vm85_vm2, %v78_v33, 920167782  ;;  %v88_v40 = vsel %vm84_vm3, %v72_v31, %v87_v37  ;;  %v95_v43 = vsel %vm85_vm2, %v81_v34, 1326507024  ;;  %v41_v15 = vmul.f32 -2.0, %v40_v10 }
  0x30   :  { %v92_v41 = vsel %vm84_vm3, %v75_v32, %v91_v39  ;;  %v96_v45 = vsel %vm84_vm3, %v78_v33, %v95_v43  ;;  %v89_v46 = vsel %vm83_vm4, %v86_v36, %v88_v40  ;;  %vm142_vm1 = vweird.f32 %v408_v1 }
  0x31   :  { %v93_v44 = vsel %vm83_vm4, %v90_v38, %v92_v41  ;;  %v97_v47 = vsel %vm83_vm4, %v94_v42, %v96_v45  ;;  %v105_v52 = vmul.u32 %v98_v35, %v89_v46  ;;  %304 = vrsqrt.f32 %v41_v15 }
  0x32   :  { %v414_v48 = vmul.u32.u64.low %v98_v35, %v93_v44  ;;  %v415_v49 = vmul.u32.u64.high %v98_v35, %v93_v44, %v414_v48  ;;  %v417_v50 = vmul.u32.u64.low %v98_v35, %v97_v47  ;;  %v418_v51 = vmul.u32.u64.high %v98_v35, %v97_v47, %v417_v50 }
  0x33   :  { %vm44_vm9 = vcmp.eq.f32.partialorder %v41_v15, inf  ;;  %vm46_vm10 = vcmp.eq.f32.partialorder %v41_v15, 0.0  ;;  %v47_v32 = vand.u32 2147483648, %v41_v15 }
  0x34   :  { %v108_v53 = vadd.s32 1, %v415_v49  ;;  %vm107_vm5 = vc.u32 %v418_v51, %v414_v48  ;;  %v106_v3 = vadd.s32 %v414_v48, %v418_v51 }
  0x36   :  { %v109_v55 = vsel %vm107_vm5, %v108_v53, %v415_v49 }
  0x37   :  { %v110_v56 = vadd.s32 %v109_v55, %v105_v52 }
  0x39   :  { %v111_v58 = vadd.s32 536870912, %v110_v56 }
  0x3b   :  { %v112_v59 = vshrl.u32 %v111_v58, 30 }
  0x3d   :  { %v113_v60 = vshll.u32 %v112_v59, 30  ;;  %v136_v20 = vsub.s32 4, %v112_v59 }
  0x3e   :  { %v305_v27 = vpop.eup %304 }
  0x3f   :  { %v114_v61 = vsub.s32 %v110_v56, %v113_v60  ;;  %v137_v23 = vsel %vm52_vm7, %v136_v20, %v112_v59  ;;  %v43_v30 = vmul.f32 %v305_v27, %v41_v15 }
  0x40   :  { %v139_v25 = vsel %vm51_vm8, 0, %v137_v23 }
  0x41   :  { %v116_v62 = vsub.s32 0, %v114_v61  ;;  %v247_v26 = vadd.s32 3, %v139_v25  ;;  %v143_v28 = vand.u32 3, %v139_v25  ;;  %v45_v33 = vsel %vm44_vm9, %v41_v15, %v43_v30 }
  0x42   :  { %v48_v38 = vsel %vm46_vm10, %v47_v32, %v45_v33 }
  0x43   :  { %v280_v63 = vmin.u32 %v116_v62, %v114_v61  ;;  %v248_v29 = vand.u32 3, %v247_v26  ;;  %vm148_vm11 = vcmp.eq.s32.totalorder %v143_v28, 2  ;;  %vm145_vm13 = vcmp.eq.s32.totalorder %v143_v28, 0 }
  0x44   :  { %vm144_vm15 = vcmp.lt.s32.totalorder %v143_v28, 2 }
  0x45   :  { %v118_v0 = vclz %v280_v63  ;;  %vm253_vm12 = vcmp.eq.s32.totalorder %v248_v29, 2  ;;  %vm250_vm14 = vcmp.eq.s32.totalorder %v248_v29, 0  ;;  %vm249_vm0 = vcmp.lt.s32.totalorder %v248_v29, 2 }
  0x47   :  { %v281_v2 = vadd.s32 4294967294, %v118_v0 }
  0x49   :  { %vm282_vm6 = vcmp.lt.s32.totalorder %v281_v2, 0 }
  0x4a   :  { %v121_v6 = vsel %vm282_vm6, 0, %v281_v2 }
  0x4b   :  { %v122_v7 = vsub.s32 32, %v121_v6  ;;  %v123_v8 = vshll.u32 %v114_v61, %v121_v6  ;;  %v126_v9 = vsub.s32 4294967266, %v121_v6 }
  0x4d   :  { %v124_v11 = vshrl.u32 %v106_v3, %v122_v7  ;;  %v127_v12 = vadd.s32 127, %v126_v9 }
  0x4f   :  { %v125_v13 = vor.u32 %v124_v11, %v123_v8  ;;  %v128_v14 = vshll.u32 %v127_v12, 23 }
  0x51   :  { %v129_v16 = vor.u32 4788187, %v128_v14  ;;  %v132_v17 = vcvt.s32.f32 %v125_v13 }
  0x53   :  { %v130_v18 = vand.u32 2147483647, %v129_v16 }
  0x55   :  { %v133_v19 = vmul.f32 %v132_v17, %v130_v18 }
  0x57   :  { %v134_v21 = vxor.u32 2147483648, %v133_v19 }
  0x59   :  { %v135_v22 = vsel %vm52_vm7, %v134_v21, %v133_v19 }
  0x5a   :  { %v138_v24 = vsel %vm51_vm8, %v408_v1, %v135_v22 }
  0x5b   :  { %306 = vcosq.f32 %v138_v24 }
  0x5c   :  { %308 = vsinq.f32 %v138_v24 }
  0x68   :  { %v307_v31 = vpop.eup %306 }
  0x69   :  { %v309_v5 = vpop.eup %308  ;;  %v149_v34 = vxor.u32 2147483648, %v307_v31 }
  0x6a   :  { %v146_v35 = vxor.u32 2147483648, %v309_v5 }
  0x6b   :  { %v150_v36 = vsel %vm148_vm11, %v149_v34, %v309_v5  ;;  %v255_v37 = vsel %vm253_vm12, %v149_v34, %v309_v5 }
  0x6c   :  { %v147_v39 = vsel %vm145_vm13, %v307_v31, %v146_v35  ;;  %v252_v40 = vsel %vm250_vm14, %v307_v31, %v146_v35 }
  0x6d   :  { %v151_v41 = vsel %vm144_vm15, %v147_v39, %v150_v36  ;;  %v256_v42 = vsel %vm249_vm0, %v252_v40, %v255_v37 }
  0x6e   :  { %v152_v43 = vsel %vm142_vm1, nan, %v151_v41  ;;  %v257_v44 = vsel %vm142_vm1, nan, %v256_v42 }
  0x6f   :  { %v153_v45 = vmul.f32 %v152_v43, %v48_v38  ;;  %v258_v46 = vmul.f32 %v257_v44, %v48_v38 }
  0x71   :  { %259 = vst [vmem:[#allocation7] sm:$0xff] %v153_v45  ;;  %260 = vst [vmem:[#allocation7 + $0x8] sm:$0xff] %v258_v46 }
  0x72   :  { %361 = shalt.err (!%p358_p0)
}
  0x73   :  { %s385_s20 = smov 128   ;;  %s386_s21 = smov 8  }
  0x74   :  { %272 = dma.vmem_to_hbm [thread:$0]  %s267_s1, 256, %s434_s2, [#allocation4], %s385_s20, %s385_s20, %s386_s21  }
  0x75   :  { %374 = dma.done.wait [#allocation4], 256  }
  0x76   :  { %375 = vsyncadd [#allocation4], 4294967040 }
  0x77   :  { %276 = vsyncpa [#allocation3], 1 }
  0x78   :  { %277 = vsyncpa [#allocation6], 1 }
  0x79   :  { %278 = vsyncpa [#allocation4], 1 }

</bundles_post_ra>
